<compile_context>
chip_gen: v7x
topology: tpu7x:2x2x1
jax: 0.10.0
libtpu: 0.0.40
codegen_flags: <defaults>
</compile_context>

<pallas_src>
import jax
import jax.numpy as jnp
import numpy as np
from jax.experimental import pallas as pl
from jax.experimental.pallas import tpu as pltpu

_EPS = 1e-5

# Logical (PyTorch) layer widths and the lane-padded widths used inside the kernel.
_LOGICAL_OUT = (512, 256, 128, 64, 3)
_PADDED_OUT = (512, 256, 128, 128, 128)
_AUX_OFFSETS = (0, 512, 768, 896, 1024)   # 128-aligned lane offsets into the aux blob
_AUX_WIDTH = 1152                          # sum of padded output widths
_NEG_PAD = -1e30                           # pad-logit bias -> exp underflows to exactly 0


def hybrid_mlp_kernel(
    x_ref, w1_ref, aux_ref,             # auto-DMA'd to VMEM by BlockSpec prologue
    w2_hbm, w3_hbm, w4_hbm, w5_hbm,     # raw HBM refs (memory_space=pl.ANY)
    o_ref,                              # [B, 128] lane-dense output (softmax probs)
    w2_buf, w3_buf, w4_buf, w5_buf,     # VMEM scratch for manually copied bf16 weights
    sems,                               # 4 DMA semaphores
):
    # Kick off all later-layer weight copies immediately so they overlap compute.
    cp2 = pltpu.make_async_copy(w2_hbm, w2_buf, sems.at[0])
    cp3 = pltpu.make_async_copy(w3_hbm, w3_buf, sems.at[1])
    cp4 = pltpu.make_async_copy(w4_hbm, w4_buf, sems.at[2])
    cp5 = pltpu.make_async_copy(w5_hbm, w5_buf, sems.at[3])
    cp2.start()
    cp3.start()
    cp4.start()
    cp5.start()

    def linear_relu_bn(h, w_bf16, off, dout):
        b = aux_ref[0:1, off:off + dout]
        gamma = aux_ref[1:2, off:off + dout]
        beta = aux_ref[2:3, off:off + dout]
        z = jnp.dot(h, w_bf16.astype(jnp.float32),
                    preferred_element_type=jnp.float32) + b
        z = jnp.maximum(z, 0.0)                                      # ReLU
        mean = jnp.mean(z, axis=0, keepdims=True)                    # training-mode BN
        centered = z - mean                                          # computed once
        var = jnp.mean(centered * centered, axis=0, keepdims=True)   # biased variance
        scale = gamma * jax.lax.rsqrt(var + _EPS)                    # folded scale/shift
        return centered * scale + beta

    x = x_ref[...].astype(jnp.float32)
    h = linear_relu_bn(x, w1_ref[...], _AUX_OFFSETS[0], _PADDED_OUT[0])
    cp2.wait()
    h = linear_relu_bn(h, w2_buf[...], _AUX_OFFSETS[1], _PADDED_OUT[1])
    cp3.wait()
    h = linear_relu_bn(h, w3_buf[...], _AUX_OFFSETS[2], _PADDED_OUT[2])
    cp4.wait()
    h = linear_relu_bn(h, w4_buf[...], _AUX_OFFSETS[3], _PADDED_OUT[3])
    cp5.wait()

    # Final Linear (padded to 128 lanes; pad columns carry a -1e30 bias) + Softmax(dim=1).
    b5 = aux_ref[0:1, _AUX_OFFSETS[4]:_AUX_OFFSETS[4] + _PADDED_OUT[4]]
    logits = jnp.dot(h, w5_buf[...].astype(jnp.float32),
                     preferred_element_type=jnp.float32) + b5
    m = jnp.max(logits, axis=1, keepdims=True)
    e = jnp.exp(logits - m)
    probs = e * pl.reciprocal(jnp.sum(e, axis=1, keepdims=True), approx=False)
    o_ref[...] = probs.astype(o_ref.dtype)


@jax.jit
def hybrid_mlp_forward(x, kernel_params):
    """x: [B, input_size] f32; kernel_params = (w1..w5 bf16 padded, aux f32 [3, 1152])."""
    w1, w2, w3, w4, w5, aux = kernel_params
    batch = x.shape[0]
    weights = (w1, w2, w3, w4, w5)

    flops = 2 * batch * sum(int(w.shape[0]) * int(w.shape[1]) for w in weights)
    bytes_accessed = (int(np.prod(x.shape)) * 4
                      + sum(int(np.prod(w.shape)) * 2 for w in weights)
                      + int(np.prod(aux.shape)) * 4
                      + batch * 128 * 4)
    cost = pl.CostEstimate(flops=flops,
                           transcendentals=batch * 128 + 4 * _AUX_WIDTH,
                           bytes_accessed=bytes_accessed)

    probs_padded = pl.pallas_call(
        hybrid_mlp_kernel,
        out_shape=jax.ShapeDtypeStruct((batch, 128), jnp.float32),
        in_specs=[
            pl.BlockSpec(memory_space=pltpu.VMEM),   # x
            pl.BlockSpec(memory_space=pltpu.VMEM),   # w1 (needed immediately)
            pl.BlockSpec(memory_space=pltpu.VMEM),   # packed bias/gamma/beta blob
            pl.BlockSpec(memory_space=pl.ANY),       # w2 (HBM, manual overlapped DMA)
            pl.BlockSpec(memory_space=pl.ANY),       # w3
            pl.BlockSpec(memory_space=pl.ANY),       # w4
            pl.BlockSpec(memory_space=pl.ANY),       # w5
        ],
        out_specs=pl.BlockSpec(memory_space=pltpu.VMEM),
        scratch_shapes=[
            pltpu.VMEM(tuple(w2.shape), jnp.bfloat16),
            pltpu.VMEM(tuple(w3.shape), jnp.bfloat16),
            pltpu.VMEM(tuple(w4.shape), jnp.bfloat16),
            pltpu.VMEM(tuple(w5.shape), jnp.bfloat16),
            pltpu.SemaphoreType.DMA((4,)),
        ],
        cost_estimate=cost,
    )(x, w1, aux, w2, w3, w4, w5)

    # Slice the 3 real classes back out of the lane-dense 128-wide result.
    return probs_padded[:, :3]


def init_params(key, input_size):
    """Build (kernel_params, logical_params).

    kernel_params: (w1..w5 bf16, lane/feature padded) + aux [3, 1152] f32 blob.
    logical_params: list of (W, b, gamma, beta) at true PyTorch shapes; W holds the
    bf16-rounded values so the pure-JAX reference matches the kernel numerics.
    """
    logical_in = (input_size, 512, 256, 128, 64)
    padded_in = (input_size, 512, 256, 128, 128)

    aux = np.zeros((3, _AUX_WIDTH), np.float32)
    aux[1, :] = 1.0                       # BN gamma defaults to 1
    kernel_ws = []
    logical = []
    for i in range(5):
        din, dout = logical_in[i], _LOGICAL_OUT[i]
        key, kw, kb = jax.random.split(key, 3)
        bound = 1.0 / (din ** 0.5)        # PyTorch default nn.Linear init
        w = jax.random.uniform(kw, (din, dout), jnp.float32, -bound, bound)
        b = jax.random.uniform(kb, (dout,), jnp.float32, -bound, bound)
        w_bf16 = w.astype(jnp.bfloat16)

        w_pad = np.zeros((padded_in[i], _PADDED_OUT[i]), np.float32)
        w_pad[:din, :dout] = np.asarray(w_bf16.astype(jnp.float32))
        kernel_ws.append(jnp.asarray(w_pad).astype(jnp.bfloat16))

        off = _AUX_OFFSETS[i]
        if i == 4:
            aux[0, off:off + _PADDED_OUT[i]] = _NEG_PAD   # pad logits -> prob 0
        aux[0, off:off + dout] = np.asarray(b)
        # gamma row already 1, beta row already 0 (fresh BatchNorm1d defaults)

        logical.append((w_bf16.astype(jnp.float32),
                        b.reshape(1, dout),
                        jnp.ones((1, dout), jnp.float32),
                        jnp.zeros((1, dout), jnp.float32)))

    kernel_params = tuple(kernel_ws) + (jnp.asarray(aux),)
    return kernel_params, logical


def reference_forward(x, logical_params):
    """Pure-JAX reference with exact PyTorch training-mode semantics (unpadded)."""
    h = x
    for w, b, gamma, beta in logical_params[:4]:
        z = jnp.maximum(h @ w + b, 0.0)
        mean = jnp.mean(z, axis=0, keepdims=True)
        var = jnp.mean((z - mean) ** 2, axis=0, keepdims=True)
        h = (z - mean) / jnp.sqrt(var + _EPS) * gamma + beta
    w5, b5, _, _ = logical_params[4]
    logits = h @ w5 + b5
    return jax.nn.softmax(logits, axis=1)


if __name__ == "__main__":
    key = jax.random.PRNGKey(0)
    batch, input_size = 8, 64

    kx, kp = jax.random.split(key)
    x = jax.random.normal(kx, (batch, input_size), jnp.float32)
    kernel_params, logical_params = init_params(kp, input_size)

    out = hybrid_mlp_forward(x, kernel_params)
    out = jax.block_until_ready(out)

    ref = reference_forward(x, logical_params)
    assert out.shape == (batch, 3)
    assert jnp.allclose(out, ref, atol=1e-4, rtol=1e-4), "mismatch vs reference"
    assert jnp.allclose(jnp.sum(out, axis=1), jnp.ones((batch,)), atol=1e-4)

    print("KERNEL_OK")
</pallas_src>

<mosaic_0001>
module attributes {stable_mosaic.version = 11 : i64} {
  func.func @hybrid_mlp_kernel(%arg0: memref<8x64xf32, #tpu.memory_space<vmem>>, %arg1: memref<64x512xbf16, #tpu.memory_space<vmem>>, %arg2: memref<3x1152xf32, #tpu.memory_space<vmem>>, %arg3: memref<512x256xbf16, #tpu.memory_space<any>>, %arg4: memref<256x128xbf16, #tpu.memory_space<any>>, %arg5: memref<128x128xbf16, #tpu.memory_space<any>>, %arg6: memref<128x128xbf16, #tpu.memory_space<any>>, %arg7: memref<8x128xf32, #tpu.memory_space<vmem>>, %arg8: memref<512x256xbf16, #tpu.memory_space<vmem>>, %arg9: memref<256x128xbf16, #tpu.memory_space<vmem>>, %arg10: memref<128x128xbf16, #tpu.memory_space<vmem>>, %arg11: memref<128x128xbf16, #tpu.memory_space<vmem>>, %arg12: memref<4x!tpu.dma_semaphore, #tpu.memory_space<semaphore_mem>>) attributes {dimension_semantics = [], scalar_prefetch = 0 : i64, scratch_operands = 5 : i64, tpu.core_type = #tpu.core_type<tc>} {
    %c0_i32 = arith.constant 0 : i32
    %0 = tpu.memref_slice %arg12[%c0_i32] : memref<4x!tpu.dma_semaphore, #tpu.memory_space<semaphore_mem>> -> memref<1x!tpu.dma_semaphore, #tpu.memory_space<semaphore_mem>>
    %1 = tpu.memref_squeeze %0 : memref<1x!tpu.dma_semaphore, #tpu.memory_space<semaphore_mem>> -> memref<!tpu.dma_semaphore, #tpu.memory_space<semaphore_mem>>
    tpu.enqueue_dma source(%arg3 : memref<512x256xbf16, #tpu.memory_space<any>>) target(%arg8 : memref<512x256xbf16, #tpu.memory_space<vmem>>) target_semaphore(%1 : memref<!tpu.dma_semaphore, #tpu.memory_space<semaphore_mem>>)
    %c1_i32 = arith.constant 1 : i32
    %2 = tpu.memref_slice %arg12[%c1_i32] : memref<4x!tpu.dma_semaphore, #tpu.memory_space<semaphore_mem>> -> memref<1x!tpu.dma_semaphore, #tpu.memory_space<semaphore_mem>>
    %3 = tpu.memref_squeeze %2 : memref<1x!tpu.dma_semaphore, #tpu.memory_space<semaphore_mem>> -> memref<!tpu.dma_semaphore, #tpu.memory_space<semaphore_mem>>
    tpu.enqueue_dma source(%arg4 : memref<256x128xbf16, #tpu.memory_space<any>>) target(%arg9 : memref<256x128xbf16, #tpu.memory_space<vmem>>) target_semaphore(%3 : memref<!tpu.dma_semaphore, #tpu.memory_space<semaphore_mem>>)
    %c2_i32 = arith.constant 2 : i32
    %4 = tpu.memref_slice %arg12[%c2_i32] : memref<4x!tpu.dma_semaphore, #tpu.memory_space<semaphore_mem>> -> memref<1x!tpu.dma_semaphore, #tpu.memory_space<semaphore_mem>>
    %5 = tpu.memref_squeeze %4 : memref<1x!tpu.dma_semaphore, #tpu.memory_space<semaphore_mem>> -> memref<!tpu.dma_semaphore, #tpu.memory_space<semaphore_mem>>
    tpu.enqueue_dma source(%arg5 : memref<128x128xbf16, #tpu.memory_space<any>>) target(%arg10 : memref<128x128xbf16, #tpu.memory_space<vmem>>) target_semaphore(%5 : memref<!tpu.dma_semaphore, #tpu.memory_space<semaphore_mem>>)
    %c3_i32 = arith.constant 3 : i32
    %6 = tpu.memref_slice %arg12[%c3_i32] : memref<4x!tpu.dma_semaphore, #tpu.memory_space<semaphore_mem>> -> memref<1x!tpu.dma_semaphore, #tpu.memory_space<semaphore_mem>>
    %7 = tpu.memref_squeeze %6 : memref<1x!tpu.dma_semaphore, #tpu.memory_space<semaphore_mem>> -> memref<!tpu.dma_semaphore, #tpu.memory_space<semaphore_mem>>
    tpu.enqueue_dma source(%arg6 : memref<128x128xbf16, #tpu.memory_space<any>>) target(%arg11 : memref<128x128xbf16, #tpu.memory_space<vmem>>) target_semaphore(%7 : memref<!tpu.dma_semaphore, #tpu.memory_space<semaphore_mem>>)
    %c0 = arith.constant 0 : index
    %c0_0 = arith.constant 0 : index
    %8 = vector.load %arg0[%c0, %c0_0] : memref<8x64xf32, #tpu.memory_space<vmem>>, vector<8x64xf32>
    %c0_1 = arith.constant 0 : index
    %c0_2 = arith.constant 0 : index
    %9 = vector.load %arg1[%c0_1, %c0_2] : memref<64x512xbf16, #tpu.memory_space<vmem>>, vector<64x512xbf16>
    %c0_3 = arith.constant 0 : index
    %c0_4 = arith.constant 0 : index
    %10 = vector.load %arg2[%c0_3, %c0_4] : memref<3x1152xf32, #tpu.memory_space<vmem>>, vector<1x512xf32>
    %c1 = arith.constant 1 : index
    %c0_5 = arith.constant 0 : index
    %11 = vector.load %arg2[%c1, %c0_5] : memref<3x1152xf32, #tpu.memory_space<vmem>>, vector<1x512xf32>
    %c2 = arith.constant 2 : index
    %c0_6 = arith.constant 0 : index
    %12 = vector.load %arg2[%c2, %c0_6] : memref<3x1152xf32, #tpu.memory_space<vmem>>, vector<1x512xf32>
    %13 = arith.extf %9 : vector<64x512xbf16> to vector<64x512xf32>
    %cst = arith.constant dense<0.000000e+00> : vector<8x512xf32>
    %14 = tpu.matmul %8, %13, %cst {dimension_numbers = #tpu.dot_dimension_numbers<[1], [0], [0], [1], [0, 0, 1, 1], [], []>} : vector<8x64xf32>, vector<64x512xf32>, vector<8x512xf32> -> vector<8x512xf32>
    %15 = vector.broadcast %10 : vector<1x512xf32> to vector<8x512xf32>
    %16 = arith.addf %14, %15 : vector<8x512xf32>
    %cst_7 = arith.constant 0.000000e+00 : f32
    %17 = vector.broadcast %cst_7 : f32 to vector<8x512xf32>
    %18 = arith.maximumf %16, %17 : vector<8x512xf32>
    %cst_8 = arith.constant dense<0.000000e+00> : vector<512xf32>
    %19 = vector.multi_reduction <add>, %18, %cst_8 [0] : vector<8x512xf32> to vector<512xf32>
    %20 = vector.shape_cast %19 : vector<512xf32> to vector<1x512xf32>
    %cst_9 = arith.constant 8.000000e+00 : f32
    %21 = vector.broadcast %cst_9 : f32 to vector<1x512xf32>
    %22 = arith.divf %20, %21 : vector<1x512xf32>
    %23 = vector.broadcast %22 : vector<1x512xf32> to vector<8x512xf32>
    %24 = arith.subf %18, %23 : vector<8x512xf32>
    %25 = arith.mulf %24, %24 : vector<8x512xf32>
    %cst_10 = arith.constant dense<0.000000e+00> : vector<512xf32>
    %26 = vector.multi_reduction <add>, %25, %cst_10 [0] : vector<8x512xf32> to vector<512xf32>
    %27 = vector.shape_cast %26 : vector<512xf32> to vector<1x512xf32>
    %cst_11 = arith.constant 8.000000e+00 : f32
    %28 = vector.broadcast %cst_11 : f32 to vector<1x512xf32>
    %29 = arith.divf %27, %28 : vector<1x512xf32>
    %cst_12 = arith.constant 9.99999974E-6 : f32
    %30 = vector.broadcast %cst_12 : f32 to vector<1x512xf32>
    %31 = arith.addf %29, %30 : vector<1x512xf32>
    %32 = math.rsqrt %31 : vector<1x512xf32>
    %33 = arith.mulf %11, %32 : vector<1x512xf32>
    %34 = vector.broadcast %33 : vector<1x512xf32> to vector<8x512xf32>
    %35 = arith.mulf %24, %34 : vector<8x512xf32>
    %36 = vector.broadcast %12 : vector<1x512xf32> to vector<8x512xf32>
    %37 = arith.addf %35, %36 : vector<8x512xf32>
    %c0_i32_13 = arith.constant 0 : i32
    %38 = tpu.memref_slice %arg12[%c0_i32_13] : memref<4x!tpu.dma_semaphore, #tpu.memory_space<semaphore_mem>> -> memref<1x!tpu.dma_semaphore, #tpu.memory_space<semaphore_mem>>
    %39 = tpu.memref_squeeze %38 : memref<1x!tpu.dma_semaphore, #tpu.memory_space<semaphore_mem>> -> memref<!tpu.dma_semaphore, #tpu.memory_space<semaphore_mem>>
    tpu.wait_dma2 semaphore(%39 : memref<!tpu.dma_semaphore, #tpu.memory_space<semaphore_mem>>) src(%arg3 : memref<512x256xbf16, #tpu.memory_space<any>>) dst(%arg8 : memref<512x256xbf16, #tpu.memory_space<vmem>>)
    %c0_14 = arith.constant 0 : index
    %c0_15 = arith.constant 0 : index
    %40 = vector.load %arg8[%c0_14, %c0_15] : memref<512x256xbf16, #tpu.memory_space<vmem>>, vector<512x256xbf16>
    %c0_16 = arith.constant 0 : index
    %c512 = arith.constant 512 : index
    %41 = vector.load %arg2[%c0_16, %c512] : memref<3x1152xf32, #tpu.memory_space<vmem>>, vector<1x256xf32>
    %c1_17 = arith.constant 1 : index
    %c512_18 = arith.constant 512 : index
    %42 = vector.load %arg2[%c1_17, %c512_18] : memref<3x1152xf32, #tpu.memory_space<vmem>>, vector<1x256xf32>
    %c2_19 = arith.constant 2 : index
    %c512_20 = arith.constant 512 : index
    %43 = vector.load %arg2[%c2_19, %c512_20] : memref<3x1152xf32, #tpu.memory_space<vmem>>, vector<1x256xf32>
    %44 = arith.extf %40 : vector<512x256xbf16> to vector<512x256xf32>
    %cst_21 = arith.constant dense<0.000000e+00> : vector<8x256xf32>
    %45 = tpu.matmul %37, %44, %cst_21 {dimension_numbers = #tpu.dot_dimension_numbers<[1], [0], [0], [1], [0, 0, 1, 1], [], []>} : vector<8x512xf32>, vector<512x256xf32>, vector<8x256xf32> -> vector<8x256xf32>
    %46 = vector.broadcast %41 : vector<1x256xf32> to vector<8x256xf32>
    %47 = arith.addf %45, %46 : vector<8x256xf32>
    %cst_22 = arith.constant 0.000000e+00 : f32
    %48 = vector.broadcast %cst_22 : f32 to vector<8x256xf32>
    %49 = arith.maximumf %47, %48 : vector<8x256xf32>
    %cst_23 = arith.constant dense<0.000000e+00> : vector<256xf32>
    %50 = vector.multi_reduction <add>, %49, %cst_23 [0] : vector<8x256xf32> to vector<256xf32>
    %51 = vector.shape_cast %50 : vector<256xf32> to vector<1x256xf32>
    %cst_24 = arith.constant 8.000000e+00 : f32
    %52 = vector.broadcast %cst_24 : f32 to vector<1x256xf32>
    %53 = arith.divf %51, %52 : vector<1x256xf32>
    %54 = vector.broadcast %53 : vector<1x256xf32> to vector<8x256xf32>
    %55 = arith.subf %49, %54 : vector<8x256xf32>
    %56 = arith.mulf %55, %55 : vector<8x256xf32>
    %cst_25 = arith.constant dense<0.000000e+00> : vector<256xf32>
    %57 = vector.multi_reduction <add>, %56, %cst_25 [0] : vector<8x256xf32> to vector<256xf32>
    %58 = vector.shape_cast %57 : vector<256xf32> to vector<1x256xf32>
    %cst_26 = arith.constant 8.000000e+00 : f32
    %59 = vector.broadcast %cst_26 : f32 to vector<1x256xf32>
    %60 = arith.divf %58, %59 : vector<1x256xf32>
    %cst_27 = arith.constant 9.99999974E-6 : f32
    %61 = vector.broadcast %cst_27 : f32 to vector<1x256xf32>
    %62 = arith.addf %60, %61 : vector<1x256xf32>
    %63 = math.rsqrt %62 : vector<1x256xf32>
    %64 = arith.mulf %42, %63 : vector<1x256xf32>
    %65 = vector.broadcast %64 : vector<1x256xf32> to vector<8x256xf32>
    %66 = arith.mulf %55, %65 : vector<8x256xf32>
    %67 = vector.broadcast %43 : vector<1x256xf32> to vector<8x256xf32>
    %68 = arith.addf %66, %67 : vector<8x256xf32>
    %c1_i32_28 = arith.constant 1 : i32
    %69 = tpu.memref_slice %arg12[%c1_i32_28] : memref<4x!tpu.dma_semaphore, #tpu.memory_space<semaphore_mem>> -> memref<1x!tpu.dma_semaphore, #tpu.memory_space<semaphore_mem>>
    %70 = tpu.memref_squeeze %69 : memref<1x!tpu.dma_semaphore, #tpu.memory_space<semaphore_mem>> -> memref<!tpu.dma_semaphore, #tpu.memory_space<semaphore_mem>>
    tpu.wait_dma2 semaphore(%70 : memref<!tpu.dma_semaphore, #tpu.memory_space<semaphore_mem>>) src(%arg4 : memref<256x128xbf16, #tpu.memory_space<any>>) dst(%arg9 : memref<256x128xbf16, #tpu.memory_space<vmem>>)
    %c0_29 = arith.constant 0 : index
    %c0_30 = arith.constant 0 : index
    %71 = vector.load %arg9[%c0_29, %c0_30] : memref<256x128xbf16, #tpu.memory_space<vmem>>, vector<256x128xbf16>
    %c0_31 = arith.constant 0 : index
    %c768 = arith.constant 768 : index
    %72 = vector.load %arg2[%c0_31, %c768] : memref<3x1152xf32, #tpu.memory_space<vmem>>, vector<1x128xf32>
    %c1_32 = arith.constant 1 : index
    %c768_33 = arith.constant 768 : index
    %73 = vector.load %arg2[%c1_32, %c768_33] : memref<3x1152xf32, #tpu.memory_space<vmem>>, vector<1x128xf32>
    %c2_34 = arith.constant 2 : index
    %c768_35 = arith.constant 768 : index
    %74 = vector.load %arg2[%c2_34, %c768_35] : memref<3x1152xf32, #tpu.memory_space<vmem>>, vector<1x128xf32>
    %75 = arith.extf %71 : vector<256x128xbf16> to vector<256x128xf32>
    %cst_36 = arith.constant dense<0.000000e+00> : vector<8x128xf32>
    %76 = tpu.matmul %68, %75, %cst_36 {dimension_numbers = #tpu.dot_dimension_numbers<[1], [0], [0], [1], [0, 0, 1, 1], [], []>} : vector<8x256xf32>, vector<256x128xf32>, vector<8x128xf32> -> vector<8x128xf32>
    %77 = vector.broadcast %72 : vector<1x128xf32> to vector<8x128xf32>
    %78 = arith.addf %76, %77 : vector<8x128xf32>
    %cst_37 = arith.constant 0.000000e+00 : f32
    %79 = vector.broadcast %cst_37 : f32 to vector<8x128xf32>
    %80 = arith.maximumf %78, %79 : vector<8x128xf32>
    %cst_38 = arith.constant dense<0.000000e+00> : vector<128xf32>
    %81 = vector.multi_reduction <add>, %80, %cst_38 [0] : vector<8x128xf32> to vector<128xf32>
    %82 = vector.shape_cast %81 : vector<128xf32> to vector<1x128xf32>
    %cst_39 = arith.constant 8.000000e+00 : f32
    %83 = vector.broadcast %cst_39 : f32 to vector<1x128xf32>
    %84 = arith.divf %82, %83 : vector<1x128xf32>
    %85 = vector.broadcast %84 : vector<1x128xf32> to vector<8x128xf32>
    %86 = arith.subf %80, %85 : vector<8x128xf32>
    %87 = arith.mulf %86, %86 : vector<8x128xf32>
    %cst_40 = arith.constant dense<0.000000e+00> : vector<128xf32>
    %88 = vector.multi_reduction <add>, %87, %cst_40 [0] : vector<8x128xf32> to vector<128xf32>
    %89 = vector.shape_cast %88 : vector<128xf32> to vector<1x128xf32>
    %cst_41 = arith.constant 8.000000e+00 : f32
    %90 = vector.broadcast %cst_41 : f32 to vector<1x128xf32>
    %91 = arith.divf %89, %90 : vector<1x128xf32>
    %cst_42 = arith.constant 9.99999974E-6 : f32
    %92 = vector.broadcast %cst_42 : f32 to vector<1x128xf32>
    %93 = arith.addf %91, %92 : vector<1x128xf32>
    %94 = math.rsqrt %93 : vector<1x128xf32>
    %95 = arith.mulf %73, %94 : vector<1x128xf32>
    %96 = vector.broadcast %95 : vector<1x128xf32> to vector<8x128xf32>
    %97 = arith.mulf %86, %96 : vector<8x128xf32>
    %98 = vector.broadcast %74 : vector<1x128xf32> to vector<8x128xf32>
    %99 = arith.addf %97, %98 : vector<8x128xf32>
    %c2_i32_43 = arith.constant 2 : i32
    %100 = tpu.memref_slice %arg12[%c2_i32_43] : memref<4x!tpu.dma_semaphore, #tpu.memory_space<semaphore_mem>> -> memref<1x!tpu.dma_semaphore, #tpu.memory_space<semaphore_mem>>
    %101 = tpu.memref_squeeze %100 : memref<1x!tpu.dma_semaphore, #tpu.memory_space<semaphore_mem>> -> memref<!tpu.dma_semaphore, #tpu.memory_space<semaphore_mem>>
    tpu.wait_dma2 semaphore(%101 : memref<!tpu.dma_semaphore, #tpu.memory_space<semaphore_mem>>) src(%arg5 : memref<128x128xbf16, #tpu.memory_space<any>>) dst(%arg10 : memref<128x128xbf16, #tpu.memory_space<vmem>>)
    %c0_44 = arith.constant 0 : index
    %c0_45 = arith.constant 0 : index
    %102 = vector.load %arg10[%c0_44, %c0_45] : memref<128x128xbf16, #tpu.memory_space<vmem>>, vector<128x128xbf16>
    %c0_46 = arith.constant 0 : index
    %c896 = arith.constant 896 : index
    %103 = vector.load %arg2[%c0_46, %c896] : memref<3x1152xf32, #tpu.memory_space<vmem>>, vector<1x128xf32>
    %c1_47 = arith.constant 1 : index
    %c896_48 = arith.constant 896 : index
    %104 = vector.load %arg2[%c1_47, %c896_48] : memref<3x1152xf32, #tpu.memory_space<vmem>>, vector<1x128xf32>
    %c2_49 = arith.constant 2 : index
    %c896_50 = arith.constant 896 : index
    %105 = vector.load %arg2[%c2_49, %c896_50] : memref<3x1152xf32, #tpu.memory_space<vmem>>, vector<1x128xf32>
    %106 = arith.extf %102 : vector<128x128xbf16> to vector<128x128xf32>
    %cst_51 = arith.constant dense<0.000000e+00> : vector<8x128xf32>
    %107 = tpu.matmul %99, %106, %cst_51 {dimension_numbers = #tpu.dot_dimension_numbers<[1], [0], [0], [1], [0, 0, 1, 1], [], []>} : vector<8x128xf32>, vector<128x128xf32>, vector<8x128xf32> -> vector<8x128xf32>
    %108 = vector.broadcast %103 : vector<1x128xf32> to vector<8x128xf32>
    %109 = arith.addf %107, %108 : vector<8x128xf32>
    %cst_52 = arith.constant 0.000000e+00 : f32
    %110 = vector.broadcast %cst_52 : f32 to vector<8x128xf32>
    %111 = arith.maximumf %109, %110 : vector<8x128xf32>
    %cst_53 = arith.constant dense<0.000000e+00> : vector<128xf32>
    %112 = vector.multi_reduction <add>, %111, %cst_53 [0] : vector<8x128xf32> to vector<128xf32>
    %113 = vector.shape_cast %112 : vector<128xf32> to vector<1x128xf32>
    %cst_54 = arith.constant 8.000000e+00 : f32
    %114 = vector.broadcast %cst_54 : f32 to vector<1x128xf32>
    %115 = arith.divf %113, %114 : vector<1x128xf32>
    %116 = vector.broadcast %115 : vector<1x128xf32> to vector<8x128xf32>
    %117 = arith.subf %111, %116 : vector<8x128xf32>
    %118 = arith.mulf %117, %117 : vector<8x128xf32>
    %cst_55 = arith.constant dense<0.000000e+00> : vector<128xf32>
    %119 = vector.multi_reduction <add>, %118, %cst_55 [0] : vector<8x128xf32> to vector<128xf32>
    %120 = vector.shape_cast %119 : vector<128xf32> to vector<1x128xf32>
    %cst_56 = arith.constant 8.000000e+00 : f32
    %121 = vector.broadcast %cst_56 : f32 to vector<1x128xf32>
    %122 = arith.divf %120, %121 : vector<1x128xf32>
    %cst_57 = arith.constant 9.99999974E-6 : f32
    %123 = vector.broadcast %cst_57 : f32 to vector<1x128xf32>
    %124 = arith.addf %122, %123 : vector<1x128xf32>
    %125 = math.rsqrt %124 : vector<1x128xf32>
    %126 = arith.mulf %104, %125 : vector<1x128xf32>
    %127 = vector.broadcast %126 : vector<1x128xf32> to vector<8x128xf32>
    %128 = arith.mulf %117, %127 : vector<8x128xf32>
    %129 = vector.broadcast %105 : vector<1x128xf32> to vector<8x128xf32>
    %130 = arith.addf %128, %129 : vector<8x128xf32>
    %c3_i32_58 = arith.constant 3 : i32
    %131 = tpu.memref_slice %arg12[%c3_i32_58] : memref<4x!tpu.dma_semaphore, #tpu.memory_space<semaphore_mem>> -> memref<1x!tpu.dma_semaphore, #tpu.memory_space<semaphore_mem>>
    %132 = tpu.memref_squeeze %131 : memref<1x!tpu.dma_semaphore, #tpu.memory_space<semaphore_mem>> -> memref<!tpu.dma_semaphore, #tpu.memory_space<semaphore_mem>>
    tpu.wait_dma2 semaphore(%132 : memref<!tpu.dma_semaphore, #tpu.memory_space<semaphore_mem>>) src(%arg6 : memref<128x128xbf16, #tpu.memory_space<any>>) dst(%arg11 : memref<128x128xbf16, #tpu.memory_space<vmem>>)
    %c0_59 = arith.constant 0 : index
    %c1024 = arith.constant 1024 : index
    %133 = vector.load %arg2[%c0_59, %c1024] : memref<3x1152xf32, #tpu.memory_space<vmem>>, vector<1x128xf32>
    %c0_60 = arith.constant 0 : index
    %c0_61 = arith.constant 0 : index
    %134 = vector.load %arg11[%c0_60, %c0_61] : memref<128x128xbf16, #tpu.memory_space<vmem>>, vector<128x128xbf16>
    %135 = arith.extf %134 : vector<128x128xbf16> to vector<128x128xf32>
    %cst_62 = arith.constant dense<0.000000e+00> : vector<8x128xf32>
    %136 = tpu.matmul %130, %135, %cst_62 {dimension_numbers = #tpu.dot_dimension_numbers<[1], [0], [0], [1], [0, 0, 1, 1], [], []>} : vector<8x128xf32>, vector<128x128xf32>, vector<8x128xf32> -> vector<8x128xf32>
    %137 = vector.broadcast %133 : vector<1x128xf32> to vector<8x128xf32>
    %138 = arith.addf %136, %137 : vector<8x128xf32>
    %cst_63 = arith.constant dense<0xFF800000> : vector<8xf32>
    %139 = vector.multi_reduction <maximumf>, %138, %cst_63 [1] : vector<8x128xf32> to vector<8xf32>
    %140 = vector.shape_cast %139 : vector<8xf32> to vector<8x1xf32>
    %141 = vector.broadcast %140 : vector<8x1xf32> to vector<8x128xf32>
    %142 = arith.subf %138, %141 : vector<8x128xf32>
    %143 = math.exp %142 : vector<8x128xf32>
    %cst_64 = arith.constant dense<0.000000e+00> : vector<8xf32>
    %144 = vector.multi_reduction <add>, %143, %cst_64 [1] : vector<8x128xf32> to vector<8xf32>
    %145 = vector.shape_cast %144 : vector<8xf32> to vector<8x1xf32>
    %146 = tpu.reciprocal %145 : vector<8x1xf32> -> vector<8x1xf32>
    %147 = vector.broadcast %146 : vector<8x1xf32> to vector<8x128xf32>
    %148 = arith.mulf %143, %147 : vector<8x128xf32>
    %c0_65 = arith.constant 0 : index
    %c0_66 = arith.constant 0 : index
    %149 = vector.load %arg7[%c0_65, %c0_66] : memref<8x128xf32, #tpu.memory_space<vmem>>, vector<8x128xf32>
    tpu.vector_store %arg7[%c0_65, %c0_66], %148 {strides = array<i32>} : memref<8x128xf32, #tpu.memory_space<vmem>>, vector<8x128xf32>,
    return
  }
}

</mosaic_0001>

<bundles_post_ra>
// kernel: hybrid_mlp_forward.1
= control target key start
LH: loop header
LB: loop body
LE: loop exit
PB: predicated region body
PF: predicated region fallthrough
CT: control target
= control target key end

     0   :  { %12 = vsyncpa [#allocation8], 0  ;;  %s2225_s0 = inlined_call_operand.hbm [shape: f32[8,64], index: 0, kind: input, shape index: {}]   ;;  %s2226_s1 = inlined_call_operand.hbm [shape: bf16[64,512], index: 1, kind: input, shape index: {}]   ;;  %s2227_s2 = inlined_call_operand.hbm [shape: f32[3,1152], index: 2, kind: input, shape index: {}]   ;;  %s2228_s3 = inlined_call_operand.hbm [shape: bf16[512,256], index: 3, kind: input, shape index: {}]   ;;  %s2229_s4 = inlined_call_operand.hbm [shape: bf16[256,128], index: 4, kind: input, shape index: {}]   ;;  %s2230_s5 = inlined_call_operand.hbm [shape: bf16[128,128], index: 5, kind: input, shape index: {}]   ;;  %s2231_s6 = inlined_call_operand.hbm [shape: bf16[128,128], index: 6, kind: input, shape index: {}]   ;;  %s2232_s7 = inlined_call_operand.vmem [shape: f32[8,128], index: 7, kind: output, shape index: {}]  }
   0x1   :  { %13 = vsyncpa [#allocation10], 0  ;;  %s1999_s24 = smov [#allocation9]   ;;  %s1855_s28 = scalar_lea.hbm %s2226_s1, 2048 }
   0x2   :  { %s29_s25 = sshll.u32 %s1999_s24, 4  ;;  %p1856_p0 = scmp.ne.s32.totalorder %s2226_s1, %s1855_s28  ;;  %s30_s25 = int_to_ptr.vmem [resolvable:$true] %s29_s25 }
   0x3   :  { %p1859_p1 = scmp.lt.u32.totalorder %s1855_s28, %s2226_s1 }
   0x5   :  { %p1861_p2 = pnand %p1859_p1, %p1856_p0 }
   0x7   :  { %1864 = shalt.err (!%p1861_p2)
}
   0x8   :  { %s1865_s10 = scalar_lea.vmem %s30_s25, 2048  ;;  %p1870_p4 = scmp.lt.s32.totalorder %s30_s25, %s30_s25 }
   0x9   :  { %p1866_p3 = scmp.ne.s32.totalorder %s30_s25, %s1865_s10  ;;  %p1871_p5 = scmp.lt.s32.totalorder %s1865_s10, %s1865_s10 }
   0xb   :  { %p1872_p6 = por %p1871_p5, %p1870_p4 }
   0xd   :  { %p1873_p7 = pnand %p1872_p6, %p1866_p3 }
   0xf   :  { %1876 = shalt.err (!%p1873_p7)
}
  0x10   :  { %s2000_s11 = smov 256   ;;  %s2001_s12 = smov 16  }
  0x11   :  { %35 = dma.hbm_to_vmem [thread:$0]  %s2226_s1, 2048, %s30_s25, [#allocation10], %s2000_s11, %s2000_s11, %s2001_s12  }
  0x12   :  { %s2002_s15 = smov [#allocation7]   ;;  %s2003_s17 = smov [#allocation11]  }
  0x13   :  { %s20_s16 = sshll.u32 %s2002_s15, 4  ;;  %s42_s18 = sshll.u32 %s2003_s17, 4  ;;  %s21_s16 = int_to_ptr.vmem [resolvable:$true] %s20_s16  ;;  %s43_s18 = int_to_ptr.vmem [resolvable:$true] %s42_s18 }
  0x14   :  { %s1877_s21 = scalar_lea.hbm %s2225_s0, 128 }
  0x15   :  { %p1878_p8 = scmp.ne.s32.totalorder %s2225_s0, %s1877_s21  ;;  %p1881_p9 = scmp.lt.u32.totalorder %s1877_s21, %s2225_s0 }
  0x17   :  { %p1883_p10 = pnand %p1881_p9, %p1878_p8 }
  0x19   :  { %1886 = shalt.err (!%p1883_p10)
}
  0x1a   :  { %s1887_s1 = scalar_lea.vmem %s21_s16, 128  ;;  %p1892_p12 = scmp.lt.s32.totalorder %s21_s16, %s21_s16 }
  0x1b   :  { %p1888_p11 = scmp.ne.s32.totalorder %s21_s16, %s1887_s1  ;;  %p1893_p13 = scmp.lt.s32.totalorder %s1887_s1, %s1887_s1 }
  0x1d   :  { %p1894_p0 = por %p1893_p13, %p1892_p12 }
  0x1f   :  { %p1895_p1 = pnand %p1894_p0, %p1888_p11 }
  0x21   :  { %1898 = shalt.err (!%p1895_p1)
}
  0x22   :  { %23 = dma.hbm_to_vmem [thread:$0]  %s2225_s0, 128, %s21_s16, [#allocation8]  }
  0x23   :  { %s1899_s30 = scalar_lea.hbm %s2227_s2, 576 }
  0x24   :  { %p1900_p2 = scmp.ne.s32.totalorder %s2227_s2, %s1899_s30  ;;  %p1903_p3 = scmp.lt.u32.totalorder %s1899_s30, %s2227_s2 }
  0x26   :  { %p1905_p4 = pnand %p1903_p3, %p1900_p2 }
  0x28   :  { %1908 = shalt.err (!%p1905_p4)
}
  0x29   :  { %s1909_s13 = scalar_lea.vmem %s43_s18, 576  ;;  %p1914_p6 = scmp.lt.s32.totalorder %s43_s18, %s43_s18 }
  0x2a   :  { %p1910_p5 = scmp.ne.s32.totalorder %s43_s18, %s1909_s13  ;;  %p1915_p7 = scmp.lt.s32.totalorder %s1909_s13, %s1909_s13 }
  0x2c   :  { %p1916_p8 = por %p1915_p7, %p1914_p6 }
  0x2e   :  { %p1917_p9 = pnand %p1916_p8, %p1910_p5 }
  0x30   :  { %1920 = shalt.err (!%p1917_p9)
}
  0x31   :  { %45 = dma.hbm_to_vmem [thread:$0]  %s2227_s2, 576, %s43_s18, [#allocation10]  }
  0x32   :  { %1987 = dma.done.wait [#allocation8], 128  }
  0x33   :  { %1988 = vsyncadd [#allocation8], 4294967168 }
  0x34   :  { %1989 = dma.done.wait [#allocation10], 2624  }
  0x35   :  { %1990 = vsyncadd [#allocation10], 4294964672  ;;  %s59_s15 = sld [smem:[#allocation0]]   ;;  %71 = sst [smem:[#allocation13]] %s2000_s11  ;;  %v2004_v0 = vmov 0.0   ;;  %vm201_vm0 = vcmask 523264  }
  0x36   :  { %269 = vmatprep.mubr.f32.mxu1 %v2004_v0  ;;  %73 = sst [smem:[#allocation13 + $0x1]] %s2000_s11  ;;  %s2005_s16 = smov 2  }
  0x37   :  { %75 = sst [smem:[#allocation13 + $0x2]] %s2005_s16  ;;  %s2006_s17 = smov 64  }
  0x38   :  { %77 = sst [smem:[#allocation13 + $0x3]] %s2006_s17  ;;  %s2007_s19 = smov 128  }
  0x39   :  { %79 = sst [smem:[#allocation13 + $0x4]] %s2007_s19  ;;  %s2008_s20 = smov [#allocation2]  }
  0x3a   :  { %s67_s2 = sshll.u32 %s2008_s20, 4  ;;  %81 = sst [smem:[#allocation13 + $0x5]] %s2005_s16  ;;  %s68_s2 = int_to_ptr.vmem [resolvable:$true] %s67_s2 }
  0x3b   :  { %s1380_s18 = sshll.u32 %s59_s15, 26  ;;  %83 = sst [smem:[#allocation13 + $0x6]] %s2007_s19 }
  0x3c   :  { %s1381_s21 = sadd.s32 134217728, %s1380_s18  ;;  %85 = sst [smem:[#allocation13 + $0x7]] %s2006_s17 }
  0x3d   :  { %s2009_s22 = smov 4   ;;  %s2010_s23 = smov [#allocation6]  }
  0x3e   :  { %87 = sst [smem:[#allocation13 + $0x8]] %s2009_s22  ;;  %s2011_s24 = smov [#allocation12]  }
  0x3f   :  { %89 = dma.general %s2228_s3, 8192, %s68_s2, %s2010_s23, %s2011_s24, [#allocation13], %s1381_s21, 0  }
  0x40   :  { %v1811_v1 = vld [vmem:[#allocation9 + $0x4] ss:$16 sps:$4 sm:$0xff]   ;;  %v1813_v2 = vld [vmem:[#allocation9] ss:$16 sps:$4 sm:$0xff]   ;;  %v1823_v9 = vld [vmem:[#allocation9 + $0xc] ss:$16 sps:$4 sm:$0xff]  }
  0x41   :  { %1533 = vmatprep.subr.bf16.mxu1 %v1811_v1  ;;  %v1814_v3 = vld [vmem:[#allocation9 + $0x24] ss:$16 sps:$4 sm:$0xff]   ;;  %v1816_v4 = vld [vmem:[#allocation9 + $0x20] ss:$16 sps:$4 sm:$0xff]   ;;  %v126_v10 = vld [vmem:[#allocation7] sm:$0xff]  ;;  %s2012_s3 = smov [#allocation3]  }
  0x42   :  { %1535 = vmatpush1.bf16.msra.mxu1 %v1813_v2  ;;  %v1817_v5 = vld [vmem:[#allocation9 + $0x44] ss:$16 sps:$4 sm:$0xff]   ;;  %v1819_v6 = vld [vmem:[#allocation9 + $0x40] ss:$16 sps:$4 sm:$0xff]   ;;  %v1825_v11 = vld [vmem:[#allocation9 + $0x8] ss:$16 sps:$4 sm:$0xff]  }
  0x43   :  { %1537 = vmatprep.subr.bf16.mxu1 %v1814_v3  ;;  %v1820_v7 = vld [vmem:[#allocation9 + $0x64] ss:$16 sps:$4 sm:$0xff]   ;;  %v1822_v8 = vld [vmem:[#allocation9 + $0x60] ss:$16 sps:$4 sm:$0xff]   ;;  %v1826_v12 = vld [vmem:[#allocation9 + $0x2c] ss:$16 sps:$4 sm:$0xff]  }
  0x44   :  { %v1828_v13 = vld [vmem:[#allocation9 + $0x28] ss:$16 sps:$4 sm:$0xff]   ;;  %v1829_v14 = vld [vmem:[#allocation9 + $0x4c] ss:$16 sps:$4 sm:$0xff]   ;;  %s98_s1 = sshll.u32 %s2012_s3, 4  ;;  %s2013_s25 = smov [#allocation4]   ;;  %s99_s1 = int_to_ptr.vmem [resolvable:$true] %s98_s1 }
  0x45   :  { %v1831_v15 = vld [vmem:[#allocation9 + $0x48] ss:$16 sps:$4 sm:$0xff]   ;;  %v1832_v16 = vld [vmem:[#allocation9 + $0x6c] ss:$16 sps:$4 sm:$0xff]   ;;  %s110_s27 = sshll.u32 %s2013_s25, 4  ;;  %s1921_s30 = scalar_lea.hbm %s2229_s4, 2048  ;;  %s111_s27 = int_to_ptr.vmem [resolvable:$true] %s110_s27 }
  0x46   :  { %1539 = vmatpush1.bf16.msra.mxu1 %v1816_v4  ;;  %v1834_v17 = vld [vmem:[#allocation9 + $0x68] ss:$16 sps:$4 sm:$0xff]   ;;  %p1922_p10 = scmp.ne.s32.totalorder %s2229_s4, %s1921_s30  ;;  %p1925_p11 = scmp.lt.u32.totalorder %s1921_s30, %s2229_s4 }
  0x47   :  { %1541 = vmatprep.subr.bf16.mxu1 %v1817_v5 }
  0x48   :  { %p1927_p12 = pnand %p1925_p11, %p1922_p10 }
  0x4a   :  { %1543 = vmatpush1.bf16.msra.mxu1 %v1819_v6 }
  0x4b   :  { %1545 = vmatprep.subr.bf16.mxu1 %v1820_v7 }
  0x4e   :  { %1547 = vmatpush1.bf16.msra.mxu1 %v1822_v8 }
  0x4f   :  { %1549 = vmatprep.subr.bf16.mxu1 %v1823_v9 }
  0x51   :  { %1382 = vmatmul.mubr.msk.f32.vlgmr.msra.gmra.mrb[0].mxu1 %vm201_vm0, %v126_v10 }
  0x52   :  { %1551 = vmatpush1.bf16.msra.mxu1 %v1825_v11  ;;  %340 = vmatprep.mubr.f32.mxu1 %v2004_v0 }
  0x53   :  { %1553 = vmatprep.subr.bf16.mxu1 %v1826_v12 }
  0x56   :  { %1555 = vmatpush1.bf16.msra.mxu1 %v1828_v13 }
  0x57   :  { %1557 = vmatprep.subr.bf16.mxu1 %v1829_v14 }
  0x5a   :  { %1559 = vmatpush1.bf16.msra.mxu1 %v1831_v15 }
  0x5b   :  { %1561 = vmatprep.subr.bf16.mxu1 %v1832_v16 }
  0x5e   :  { %1563 = vmatpush1.bf16.msra.mxu1 %v1834_v17 }
  0x61   :  { %1383 = vmatmul.mubr.msk.f32.vlgmr.msra.gmra.mrb[2].mxu1 %vm201_vm0, %v126_v10 }
  0x62   :  { %1930 = shalt.err (!%p1927_p12)  }
  0x63   :  { %s1931_s13 = scalar_lea.vmem %s99_s1, 2048  ;;  %p1936_p0 = scmp.lt.s32.totalorder %s99_s1, %s99_s1 }
  0x64   :  { %p1932_p13 = scmp.ne.s32.totalorder %s99_s1, %s1931_s13  ;;  %p1937_p1 = scmp.lt.s32.totalorder %s1931_s13, %s1931_s13 }
  0x66   :  { %p1938_p2 = por %p1937_p1, %p1936_p0 }
  0x68   :  { %p1939_p3 = pnand %p1938_p2, %p1932_p13 }
  0x6a   :  { %1942 = shalt.err (!%p1939_p3)  }
  0x6b   :  { %101 = dma.hbm_to_vmem [thread:$0]  %s2229_s4, 2048, %s99_s1, [#allocation6 + $0x1] }
  0x6c   :  { %s1943_s17 = scalar_lea.hbm %s2230_s5, 1024 }
  0x6d   :  { %p1944_p4 = scmp.ne.s32.totalorder %s2230_s5, %s1943_s17  ;;  %p1947_p5 = scmp.lt.u32.totalorder %s1943_s17, %s2230_s5 }
  0x6f   :  { %p1949_p6 = pnand %p1947_p5, %p1944_p4 }
  0x71   :  { %1952 = shalt.err (!%p1949_p6)  }
  0x72   :  { %s1953_s21 = scalar_lea.vmem %s111_s27, 1024  ;;  %p1958_p8 = scmp.lt.s32.totalorder %s111_s27, %s111_s27 }
  0x73   :  { %p1954_p7 = scmp.ne.s32.totalorder %s111_s27, %s1953_s21  ;;  %p1959_p9 = scmp.lt.s32.totalorder %s1953_s21, %s1953_s21 }
  0x75   :  { %p1960_p10 = por %p1959_p9, %p1958_p8 }
  0x77   :  { %p1961_p11 = pnand %p1960_p10, %p1954_p7 }
  0x79   :  { %1964 = shalt.err (!%p1961_p11)  }
  0x7a   :  { %113 = dma.hbm_to_vmem [thread:$0]  %s2230_s5, 1024, %s111_s27, [#allocation6 + $0x2] }
  0x7b   :  { %s2014_s23 = smov [#allocation5]   ;;  %s1965_s3 = scalar_lea.hbm %s2231_s6, 1024 }
  0x7c   :  { %s122_s24 = sshll.u32 %s2014_s23, 4  ;;  %p1966_p12 = scmp.ne.s32.totalorder %s2231_s6, %s1965_s3  ;;  %s123_s24 = int_to_ptr.vmem [resolvable:$true] %s122_s24 }
  0x7d   :  { %p1969_p13 = scmp.lt.u32.totalorder %s1965_s3, %s2231_s6 }
  0x7f   :  { %p1971_p0 = pnand %p1969_p13, %p1966_p12 }
  0x81   :  { %1974 = shalt.err (!%p1971_p0)  }
  0x82   :  { %s1975_s30 = scalar_lea.vmem %s123_s24, 1024  ;;  %p1980_p2 = scmp.lt.s32.totalorder %s123_s24, %s123_s24 }
  0x83   :  { %p1976_p1 = scmp.ne.s32.totalorder %s123_s24, %s1975_s30  ;;  %p1981_p3 = scmp.lt.s32.totalorder %s1975_s30, %s1975_s30 }
  0x85   :  { %p1982_p4 = por %p1981_p3, %p1980_p2 }
  0x87   :  { %p1983_p5 = pnand %p1982_p4, %p1976_p1 }
  0x89   :  { %1986 = shalt.err (!%p1983_p5)  }
  0x8a   :  { %125 = dma.hbm_to_vmem [thread:$0]  %s2231_s6, 1024, %s123_s24, [#allocation6 + $0x3]  ;;  %v181_v18 = vlaneseq  ;;  %v143_v21 = vld [vmem:[#allocation11] ss:$4 sm:$0xf] }
  0x8c   :  { %v2141_v19 = vshrl.u32 %v181_v18, 7 }
  0x8e   :  { %v2144_v20 = vsub.s32 0, %v2141_v19  ;;  %v2147_v22 = vsub.s32 1, %v2141_v19  ;;  %v2152_v36 = vsub.s32 2, %v2141_v19  ;;  %v2155_v38 = vsub.s32 3, %v2141_v19 }
  0x90   :  { %v184_v23 = vrot.slane %v143_v21, %v2144_v20  ;;  %v188_v24 = vrot.slane %v143_v21, %v2147_v22  ;;  %v192_v42 = vrot.slane %v143_v21, %v2152_v36  ;;  %v196_v44 = vrot.slane %v143_v21, %v2155_v38 }
 0x124   :  { %v271_v25 = vpop.f32.mrb[0].mxu1 }
 0x125   :  { %v272_v26 = vadd.f32 %v271_v25, %v184_v23  ;;  %v273_v27 = vpop.f32.mrb[1].mxu1 }
 0x126   :  { %v274_v28 = vadd.f32 %v273_v27, %v188_v24 }
 0x127   :  { %v347_v29 = vmax.f32 %v272_v26, 0.0 }
 0x128   :  { %v348_v30 = vmax.f32 %v274_v28, 0.0 }
 0x129   :  { %v351_v31 = vrot.slane %v347_v29, 4 }
 0x12a   :  { %v357_v32 = vrot.slane %v348_v30, 4 }
 0x12b   :  { %v352_v33 = vadd.f32 %v351_v31, %v347_v29 }
 0x12c   :  { %v358_v34 = vadd.f32 %v357_v32, %v348_v30 }
 0x12d   :  { %v353_v35 = vrot.slane %v352_v33, 2 }
 0x12e   :  { %v359_v37 = vrot.slane %v358_v34, 2 }
 0x12f   :  { %v354_v39 = vadd.f32 %v353_v35, %v352_v33 }
 0x130   :  { %v360_v40 = vadd.f32 %v359_v37, %v358_v34 }
 0x131   :  { %v355_v41 = vrot.slane %v354_v39, 1 }
 0x132   :  { %v361_v43 = vrot.slane %v360_v40, 1 }
 0x133   :  { %v356_v45 = vadd.f32 %v355_v41, %v354_v39 }
 0x134   :  { %v362_v46 = vadd.f32 %v361_v43, %v360_v40  ;;  %v342_v47 = vpop.f32.mrb[2].mxu1 }
 0x135   :  { %v376_v48 = vmul.f32 0.125, %v356_v45  ;;  %v343_v49 = vadd.f32 %v342_v47, %v192_v42  ;;  %v344_v50 = vpop.f32.mrb[3].mxu1 }
 0x136   :  { %v377_v51 = vmul.f32 0.125, %v362_v46  ;;  %v345_v52 = vadd.f32 %v344_v50, %v196_v44 }
 0x137   :  { %v2159_v53 = vsub.f32 %v347_v29, %v376_v48  ;;  %v349_v54 = vmax.f32 %v343_v49, 0.0 }
 0x138   :  { %v2161_v55 = vsub.f32 %v348_v30, %v377_v51  ;;  %v350_v56 = vmax.f32 %v345_v52, 0.0 }
 0x139   :  { %v384_v57 = vmul.f32 %v2159_v53, %v2159_v53  ;;  %v363_v58 = vrot.slane %v349_v54, 4 }
 0x13a   :  { %v385_v59 = vmul.f32 %v2161_v55, %v2161_v55  ;;  %v369_v60 = vrot.slane %v350_v56, 4 }
 0x13b   :  { %v388_v61 = vrot.slane %v384_v57, 4  ;;  %v364_v62 = vadd.f32 %v363_v58, %v349_v54 }
 0x13c   :  { %v394_v63 = vrot.slane %v385_v59, 4  ;;  %v370_v1 = vadd.f32 %v369_v60, %v350_v56 }
 0x13d   :  { %v389_v2 = vadd.f32 %v388_v61, %v384_v57  ;;  %v365_v3 = vrot.slane %v364_v62, 2 }
 0x13e   :  { %v395_v4 = vadd.f32 %v394_v63, %v385_v59  ;;  %v371_v5 = vrot.slane %v370_v1, 2 }
 0x13f   :  { %v390_v6 = vrot.slane %v389_v2, 2  ;;  %v366_v7 = vadd.f32 %v365_v3, %v364_v62  ;;  %v145_v3 = vld [vmem:[#allocation11 + $0x1] ss:$4 sm:$0xf] }
 0x140   :  { %v396_v8 = vrot.slane %v395_v4, 2  ;;  %v372_v9 = vadd.f32 %v371_v5, %v370_v1 }
 0x141   :  { %v391_v10 = vadd.f32 %v390_v6, %v389_v2  ;;  %v367_v11 = vrot.slane %v366_v7, 1 }
 0x142   :  { %v397_v12 = vadd.f32 %v396_v8, %v395_v4  ;;  %v373_v13 = vrot.slane %v372_v9, 1  ;;  %v147_v4 = vld [vmem:[#allocation11 + $0x2] ss:$4 sm:$0xf] }
 0x143   :  { %v392_v14 = vrot.slane %v391_v10, 1  ;;  %v368_v15 = vadd.f32 %v367_v11, %v366_v7  ;;  %v483_v7 = vrot.slane %v147_v4, %v2144_v20  ;;  %v487_v8 = vrot.slane %v147_v4, %v2147_v22 }
 0x144   :  { %v398_v16 = vrot.slane %v397_v12, 1  ;;  %v374_v17 = vadd.f32 %v373_v13, %v372_v9  ;;  %v491_v9 = vrot.slane %v147_v4, %v2152_v36 }
 0x145   :  { %v393_v18 = vadd.f32 %v392_v14, %v391_v10  ;;  %v378_v21 = vmul.f32 0.125, %v368_v15 }
 0x146   :  { %v399_v23 = vadd.f32 %v398_v16, %v397_v12  ;;  %v379_v24 = vmul.f32 0.125, %v374_v17 }
 0x147   :  { %v412_v25 = vmul.f32 0.125, %v393_v18  ;;  %v382_v26 = vsub.f32 %v349_v54, %v378_v21 }
 0x148   :  { %v413_v27 = vmul.f32 0.125, %v399_v23  ;;  %v383_v28 = vsub.f32 %v350_v56, %v379_v24  ;;  %v2015_v56 = vmov 1966171168  }
 0x149   :  { %v416_v29 = vadd.f32 1e-05, %v412_v25  ;;  %v386_v30 = vmul.f32 %v382_v26, %v382_v26  ;;  %v431_v57 = vunpack.c.l.s4 %v2015_v56 }
 0x14a   :  { %v417_v31 = vadd.f32 1e-05, %v413_v27  ;;  %v387_v32 = vmul.f32 %v383_v28, %v383_v28 }
 0x14b   :  { %1835 = vrsqrt.f32 %v416_v29  ;;  %v400_v33 = vrot.slane %v386_v30, 4  ;;  %v432_v58 = vunpack.c.0.s8 %v431_v57 }
 0x14c   :  { %1837 = vrsqrt.f32 %v417_v31  ;;  %v406_v34 = vrot.slane %v387_v32, 4 }
 0x14d   :  { %v401_v35 = vadd.f32 %v400_v33, %v386_v30  ;;  %v2168_v60 = vsub.s32 %v432_v58, %v2141_v19  ;;  %v495_v19 = vrot.slane %v147_v4, %v2155_v38 }
 0x14e   :  { %v407_v37 = vadd.f32 %v406_v34, %v387_v32 }
 0x14f   :  { %v402_v39 = vrot.slane %v401_v35, 2 }
 0x150   :  { %v408_v40 = vrot.slane %v407_v37, 2 }
 0x151   :  { %v403_v41 = vadd.f32 %v402_v39, %v401_v35 }
 0x152   :  { %v409_v42 = vadd.f32 %v408_v40, %v407_v37 }
 0x153   :  { %v404_v43 = vrot.slane %v403_v41, 1 }
 0x154   :  { %v410_v44 = vrot.slane %v409_v42, 1 }
 0x155   :  { %v1836_v45 = vpop.eup %1835  ;;  %v405_v46 = vadd.f32 %v404_v43, %v403_v41 }
 0x156   :  { %v1838_v47 = vpop.eup %1837  ;;  %v411_v48 = vadd.f32 %v410_v44, %v409_v42 }
 0x157   :  { %v414_v49 = vmul.f32 0.125, %v405_v46  ;;  %v428_v50 = vcombine.low %v1836_v45, %v1838_v47 }
 0x158   :  { %v415_v51 = vmul.f32 0.125, %v411_v48 }
 0x159   :  { %v418_v52 = vadd.f32 1e-05, %v414_v49  ;;  %v436_v63 = vrot.slane %v428_v50, %v2168_v60 }
 0x15a   :  { %v419_v54 = vadd.f32 1e-05, %v415_v51 }
 0x15b   :  { %1839 = vrsqrt.f32 %v418_v52 }
 0x15c   :  { %1841 = vrsqrt.f32 %v419_v54 }
 0x165   :  { %v1840_v59 = vpop.eup %1839 }
 0x166   :  { %v1842_v61 = vpop.eup %1841 }
 0x167   :  { %v429_v62 = vcombine.low %v1840_v59, %v1842_v61 }
 0x169   :  { %v443_v1 = vrot.slane %v429_v62, %v2168_v60 }
 0x16b   :  { %v444_v2 = vcombine.low %v436_v63, %v443_v1 }
 0x16d   :  { %v451_v5 = vrot.slane %v444_v2, %v2168_v60 }
 0x16f   :  { %v453_v6 = vmul.f32 %v451_v5, %v145_v3 }
 0x171   :  { %v458_v10 = vrot.slane %v453_v6, %v2144_v20  ;;  %v462_v11 = vrot.slane %v453_v6, %v2147_v22  ;;  %v466_v12 = vrot.slane %v453_v6, %v2152_v36  ;;  %v470_v13 = vrot.slane %v453_v6, %v2155_v38 }
 0x173   :  { %v475_v14 = vmul.f32 %v458_v10, %v2159_v53  ;;  %v476_v15 = vmul.f32 %v462_v11, %v2161_v55  ;;  %v477_v16 = vmul.f32 %v466_v12, %v382_v26  ;;  %v478_v17 = vmul.f32 %v470_v13, %v383_v28 }
 0x175   :  { %v2183_v18 = vadd.f32 %v483_v7, %v475_v14  ;;  %v501_v21 = vadd.f32 %v487_v8, %v476_v15  ;;  %v2185_v23 = vadd.f32 %v491_v9, %v477_v16  ;;  %v2187_v24 = vadd.f32 %v495_v19, %v478_v17 }
 0x176   :  { %1991 = dma.done.wait [#allocation6], 8192 }
 0x177   :  { %1992 = vsyncadd [#allocation6], 4294959104  ;;  %781 = vmatprep.mubr.f32.mxu0 %v501_v21  ;;  %v509_v25 = vld [vmem:[#allocation2 + $0x8] sm:$0xff]  ;;  %v508_v36 = vld [vmem:[#allocation2] sm:$0xff] }
 0x178   :  { %v511_v27 = vld [vmem:[#allocation2 + $0x18] sm:$0xff]  ;;  %1565 = vmatprep.subr.bf16.mxu0 %v509_v25  ;;  %v510_v38 = vld [vmem:[#allocation2 + $0x10] sm:$0xff]  ;;  %v513_v53 = vld [vmem:[#allocation2 + $0x28] sm:$0xff] }
 0x179   :  { %1567 = vmatpush1.bf16.msra.mxu0 %v508_v36  ;;  %v512_v55 = vld [vmem:[#allocation2 + $0x20] sm:$0xff]  ;;  %v515_v26 = vld [vmem:[#allocation2 + $0x38] sm:$0xff]  ;;  %v514_v28 = vld [vmem:[#allocation2 + $0x30] sm:$0xff] }
 0x17a   :  { %1569 = vmatprep.subr.bf16.mxu0 %v511_v27  ;;  %v517_v29 = vld [vmem:[#allocation2 + $0x48] sm:$0xff]  ;;  %v516_v30 = vld [vmem:[#allocation2 + $0x40] sm:$0xff]  ;;  %v519_v31 = vld [vmem:[#allocation2 + $0x58] sm:$0xff] }
 0x17b   :  { %v518_v32 = vld [vmem:[#allocation2 + $0x50] sm:$0xff]  ;;  %v521_v33 = vld [vmem:[#allocation2 + $0x68] sm:$0xff]  ;;  %v520_v34 = vld [vmem:[#allocation2 + $0x60] sm:$0xff] }
 0x17c   :  { %v523_v35 = vld [vmem:[#allocation2 + $0x78] sm:$0xff]  ;;  %v522_v37 = vld [vmem:[#allocation2 + $0x70] sm:$0xff]  ;;  %v525_v39 = vld [vmem:[#allocation2 + $0x88] sm:$0xff] }
 0x17d   :  { %1571 = vmatpush1.bf16.msra.mxu0 %v510_v38  ;;  %v524_v40 = vld [vmem:[#allocation2 + $0x80] sm:$0xff]  ;;  %v527_v41 = vld [vmem:[#allocation2 + $0x98] sm:$0xff]  ;;  %v526_v42 = vld [vmem:[#allocation2 + $0x90] sm:$0xff] }
 0x17e   :  { %1573 = vmatprep.subr.bf16.mxu0 %v513_v53  ;;  %v529_v43 = vld [vmem:[#allocation2 + $0xa8] sm:$0xff]  ;;  %v528_v44 = vld [vmem:[#allocation2 + $0xa0] sm:$0xff]  ;;  %v531_v45 = vld [vmem:[#allocation2 + $0xb8] sm:$0xff] }
 0x17f   :  { %v530_v46 = vld [vmem:[#allocation2 + $0xb0] sm:$0xff]  ;;  %v533_v47 = vld [vmem:[#allocation2 + $0xc8] sm:$0xff]  ;;  %v532_v48 = vld [vmem:[#allocation2 + $0xc0] sm:$0xff] }
 0x180   :  { %v535_v49 = vld [vmem:[#allocation2 + $0xd8] sm:$0xff]  ;;  %v534_v50 = vld [vmem:[#allocation2 + $0xd0] sm:$0xff]  ;;  %v537_v51 = vld [vmem:[#allocation2 + $0xe8] sm:$0xff] }
 0x181   :  { %1575 = vmatpush1.bf16.msra.mxu0 %v512_v55  ;;  %v536_v52 = vld [vmem:[#allocation2 + $0xe0] sm:$0xff]  ;;  %v539_v54 = vld [vmem:[#allocation2 + $0xf8] sm:$0xff]  ;;  %v538_v56 = vld [vmem:[#allocation2 + $0xf0] sm:$0xff] }
 0x182   :  { %1577 = vmatprep.subr.bf16.mxu0 %v515_v26  ;;  %v541_v57 = vld [vmem:[#allocation2 + $0x108] sm:$0xff]  ;;  %v540_v58 = vld [vmem:[#allocation2 + $0x100] sm:$0xff]  ;;  %v543_v59 = vld [vmem:[#allocation2 + $0x118] sm:$0xff] }
 0x183   :  { %v542_v61 = vld [vmem:[#allocation2 + $0x110] sm:$0xff]  ;;  %v545_v62 = vld [vmem:[#allocation2 + $0x128] sm:$0xff]  ;;  %v544_v63 = vld [vmem:[#allocation2 + $0x120] sm:$0xff] }
 0x184   :  { %v547_v1 = vld [vmem:[#allocation2 + $0x138] sm:$0xff]  ;;  %v546_v2 = vld [vmem:[#allocation2 + $0x130] sm:$0xff]  ;;  %v549_v3 = vld [vmem:[#allocation2 + $0x148] sm:$0xff] }
 0x185   :  { %1579 = vmatpush1.bf16.msra.mxu0 %v514_v28  ;;  %v548_v4 = vld [vmem:[#allocation2 + $0x140] sm:$0xff]  ;;  %v551_v5 = vld [vmem:[#allocation2 + $0x158] sm:$0xff]  ;;  %v550_v6 = vld [vmem:[#allocation2 + $0x150] sm:$0xff] }
 0x186   :  { %1581 = vmatprep.subr.bf16.mxu0 %v517_v29  ;;  %v553_v7 = vld [vmem:[#allocation2 + $0x168] sm:$0xff]  ;;  %v552_v8 = vld [vmem:[#allocation2 + $0x160] sm:$0xff]  ;;  %v555_v9 = vld [vmem:[#allocation2 + $0x178] sm:$0xff] }
 0x187   :  { %v554_v19 = vld [vmem:[#allocation2 + $0x170] sm:$0xff]  ;;  %v557_v10 = vld [vmem:[#allocation2 + $0x188] sm:$0xff]  ;;  %v556_v11 = vld [vmem:[#allocation2 + $0x180] sm:$0xff] }
 0x188   :  { %v559_v12 = vld [vmem:[#allocation2 + $0x198] sm:$0xff]  ;;  %v558_v13 = vld [vmem:[#allocation2 + $0x190] sm:$0xff]  ;;  %v561_v14 = vld [vmem:[#allocation2 + $0x1a8] sm:$0xff] }
 0x189   :  { %1583 = vmatpush1.bf16.msra.mxu0 %v516_v30  ;;  %v560_v15 = vld [vmem:[#allocation2 + $0x1a0] sm:$0xff]  ;;  %v563_v16 = vld [vmem:[#allocation2 + $0x1b8] sm:$0xff]  ;;  %v562_v17 = vld [vmem:[#allocation2 + $0x1b0] sm:$0xff] }
 0x18a   :  { %1585 = vmatprep.subr.bf16.mxu0 %v519_v31  ;;  %v564_v21 = vld [vmem:[#allocation2 + $0x1c0] sm:$0xff]  ;;  %v566_v25 = vld [vmem:[#allocation2 + $0x1d0] sm:$0xff]  ;;  %v569_v36 = vld [vmem:[#allocation2 + $0x1e8] sm:$0xff] }
 0x18b   :  { %v568_v27 = vld [vmem:[#allocation2 + $0x1e0] sm:$0xff]  ;;  %v571_v38 = vld [vmem:[#allocation2 + $0x1f8] sm:$0xff]  ;;  %v570_v53 = vld [vmem:[#allocation2 + $0x1f0] sm:$0xff] }
 0x18c   :  { %v573_v55 = vld [vmem:[#allocation11 + $0x10] ss:$4 sm:$0x3] }
 0x18d   :  { %1587 = vmatpush1.bf16.msra.mxu0 %v518_v32  ;;  %v710_v26 = vrot.slane %v573_v55, %v2144_v20  ;;  %v714_v28 = vrot.slane %v573_v55, %v2147_v22 }
 0x18e   :  { %1589 = vmatprep.subr.bf16.mxu0 %v521_v33 }
 0x191   :  { %1591 = vmatpush1.bf16.msra.mxu0 %v520_v34 }
 0x192   :  { %1593 = vmatprep.subr.bf16.mxu0 %v523_v35 }
 0x195   :  { %1595 = vmatpush1.bf16.msra.mxu0 %v522_v37 }
 0x196   :  { %1597 = vmatprep.subr.bf16.mxu0 %v525_v39 }
 0x199   :  { %1599 = vmatpush1.bf16.msra.mxu0 %v524_v40 }
 0x19a   :  { %1601 = vmatprep.subr.bf16.mxu0 %v527_v41 }
 0x19d   :  { %1603 = vmatpush1.bf16.msra.mxu0 %v526_v42 }
 0x19e   :  { %1605 = vmatprep.subr.bf16.mxu0 %v529_v43 }
 0x1a1   :  { %1607 = vmatpush1.bf16.msra.mxu0 %v528_v44 }
 0x1a2   :  { %1609 = vmatprep.subr.bf16.mxu0 %v531_v45 }
 0x1a5   :  { %1611 = vmatpush1.bf16.msra.mxu0 %v530_v46 }
 0x1a6   :  { %1613 = vmatprep.subr.bf16.mxu0 %v533_v47 }
 0x1a9   :  { %1615 = vmatpush1.bf16.msra.mxu0 %v532_v48 }
 0x1aa   :  { %1617 = vmatprep.subr.bf16.mxu0 %v535_v49 }
 0x1ad   :  { %1619 = vmatpush1.bf16.msra.mxu0 %v534_v50 }
 0x1ae   :  { %1621 = vmatprep.subr.bf16.mxu0 %v537_v51 }
 0x1b1   :  { %1623 = vmatpush1.bf16.msra.mxu0 %v536_v52 }
 0x1b2   :  { %1625 = vmatprep.subr.bf16.mxu0 %v539_v54 }
 0x1b5   :  { %1627 = vmatpush1.bf16.msra.mxu0 %v538_v56 }
 0x1b6   :  { %1629 = vmatprep.subr.bf16.mxu0 %v541_v57 }
 0x1b8   :  { %782 = vmatmul.mubr.f32.vlgmr.msra.gmra.mrb[0].mxu0 %v2183_v18  ;;  %v565_v18 = vld [vmem:[#allocation2 + $0x1c8] sm:$0xff] }
 0x1b9   :  { %1631 = vmatpush1.bf16.msra.mxu0 %v540_v58  ;;  %852 = vmatprep.mubr.f32.mxu0 %v2187_v24  ;;  %v567_v24 = vld [vmem:[#allocation2 + $0x1d8] sm:$0xff] }
 0x1ba   :  { %1633 = vmatprep.subr.bf16.mxu0 %v543_v59 }
 0x1bd   :  { %1635 = vmatpush1.bf16.msra.mxu0 %v542_v61 }
 0x1be   :  { %1637 = vmatprep.subr.bf16.mxu0 %v545_v62 }
 0x1c1   :  { %1639 = vmatpush1.bf16.msra.mxu0 %v544_v63 }
 0x1c2   :  { %1641 = vmatprep.subr.bf16.mxu0 %v547_v1 }
 0x1c5   :  { %1643 = vmatpush1.bf16.msra.mxu0 %v546_v2 }
 0x1c6   :  { %1645 = vmatprep.subr.bf16.mxu0 %v549_v3 }
 0x1c9   :  { %1647 = vmatpush1.bf16.msra.mxu0 %v548_v4 }
 0x1ca   :  { %1649 = vmatprep.subr.bf16.mxu0 %v551_v5 }
 0x1cd   :  { %1651 = vmatpush1.bf16.msra.mxu0 %v550_v6 }
 0x1ce   :  { %1653 = vmatprep.subr.bf16.mxu0 %v553_v7 }
 0x1d1   :  { %1655 = vmatpush1.bf16.msra.mxu0 %v552_v8 }
 0x1d2   :  { %1657 = vmatprep.subr.bf16.mxu0 %v555_v9 }
 0x1d5   :  { %1659 = vmatpush1.bf16.msra.mxu0 %v554_v19 }
 0x1d6   :  { %1661 = vmatprep.subr.bf16.mxu0 %v557_v10 }
 0x1d9   :  { %1663 = vmatpush1.bf16.msra.mxu0 %v556_v11 }
 0x1da   :  { %1665 = vmatprep.subr.bf16.mxu0 %v559_v12 }
 0x1dd   :  { %1667 = vmatpush1.bf16.msra.mxu0 %v558_v13  ;;  %v575_v13 = vld [vmem:[#allocation11 + $0x11] ss:$4 sm:$0x3] }
 0x1de   :  { %1669 = vmatprep.subr.bf16.mxu0 %v561_v14 }
 0x1e1   :  { %1671 = vmatpush1.bf16.msra.mxu0 %v560_v15  ;;  %v577_v15 = vld [vmem:[#allocation11 + $0x12] ss:$4 sm:$0x3] }
 0x1e2   :  { %1673 = vmatprep.subr.bf16.mxu0 %v563_v16 }
 0x1e5   :  { %1675 = vmatpush1.bf16.msra.mxu0 %v562_v17 }
 0x1e6   :  { %1677 = vmatprep.subr.bf16.mxu0 %v565_v18 }
 0x1e9   :  { %1679 = vmatpush1.bf16.msra.mxu0 %v564_v21  ;;  %v933_v21 = vrot.slane %v577_v15, %v2144_v20 }
 0x1ea   :  { %1681 = vmatprep.subr.bf16.mxu0 %v567_v24  ;;  %v937_v24 = vrot.slane %v577_v15, %v2147_v22 }
 0x1ed   :  { %1683 = vmatpush1.bf16.msra.mxu0 %v566_v25 }
 0x1ee   :  { %1685 = vmatprep.subr.bf16.mxu0 %v569_v36 }
 0x1f1   :  { %1687 = vmatpush1.bf16.msra.mxu0 %v568_v27 }
 0x1f2   :  { %1689 = vmatprep.subr.bf16.mxu0 %v571_v38 }
 0x1f5   :  { %1691 = vmatpush1.bf16.msra.mxu0 %v570_v53 }
 0x1f8   :  { %853 = vmatmul.mubr.f32.vlgmr.msra.gmra.mrb[0].mxu0 %v2185_v23 }
 0x2cb   :  { %v854_v29 = vpop.f32.mrb[0].mxu0 }
 0x2cc   :  { %v1772_v30 = vadd.f32 %v854_v29, %v710_v26  ;;  %v856_v31 = vpop.f32.mrb[1].mxu0 }
 0x2cd   :  { %v1773_v32 = vadd.f32 %v856_v31, %v714_v28 }
 0x2ce   :  { %v859_v33 = vmax.f32 %v1772_v30, 0.0 }
 0x2cf   :  { %v860_v34 = vmax.f32 %v1773_v32, 0.0 }
 0x2d0   :  { %v861_v35 = vrot.slane %v859_v33, 4 }
 0x2d1   :  { %v867_v37 = vrot.slane %v860_v34, 4 }
 0x2d2   :  { %v862_v39 = vadd.f32 %v861_v35, %v859_v33 }
 0x2d3   :  { %v868_v40 = vadd.f32 %v867_v37, %v860_v34 }
 0x2d4   :  { %v863_v41 = vrot.slane %v862_v39, 2 }
 0x2d5   :  { %v869_v42 = vrot.slane %v868_v40, 2 }
 0x2d6   :  { %v864_v43 = vadd.f32 %v863_v41, %v862_v39 }
 0x2d7   :  { %v870_v44 = vadd.f32 %v869_v42, %v868_v40 }
 0x2d8   :  { %v865_v23 = vrot.slane %v864_v43, 1 }
 0x2d9   :  { %v871_v45 = vrot.slane %v870_v44, 1 }
 0x2da   :  { %v866_v46 = vadd.f32 %v865_v23, %v864_v43 }
 0x2db   :  { %v872_v47 = vadd.f32 %v871_v45, %v870_v44 }
 0x2dc   :  { %v873_v48 = vmul.f32 0.125, %v866_v46 }
 0x2dd   :  { %v874_v49 = vmul.f32 0.125, %v872_v47 }
 0x2de   :  { %v875_v50 = vsub.f32 %v859_v33, %v873_v48 }
 0x2df   :  { %v876_v51 = vsub.f32 %v860_v34, %v874_v49 }
 0x2e0   :  { %v877_v52 = vmul.f32 %v875_v50, %v875_v50 }
 0x2e1   :  { %v878_v54 = vmul.f32 %v876_v51, %v876_v51 }
 0x2e2   :  { %v879_v56 = vrot.slane %v877_v52, 4 }
 0x2e3   :  { %v885_v57 = vrot.slane %v878_v54, 4 }
 0x2e4   :  { %v880_v58 = vadd.f32 %v879_v56, %v877_v52 }
 0x2e5   :  { %v886_v59 = vadd.f32 %v885_v57, %v878_v54 }
 0x2e6   :  { %v881_v61 = vrot.slane %v880_v58, 2 }
 0x2e7   :  { %v887_v62 = vrot.slane %v886_v59, 2 }
 0x2e8   :  { %v882_v63 = vadd.f32 %v881_v61, %v880_v58 }
 0x2e9   :  { %v888_v1 = vadd.f32 %v887_v62, %v886_v59 }
 0x2ea   :  { %v883_v2 = vrot.slane %v882_v63, 1 }
 0x2eb   :  { %v889_v3 = vrot.slane %v888_v1, 1 }
 0x2ec   :  { %v884_v4 = vadd.f32 %v883_v2, %v882_v63 }
 0x2ed   :  { %v890_v5 = vadd.f32 %v889_v3, %v888_v1 }
 0x2ee   :  { %v891_v6 = vmul.f32 0.125, %v884_v4 }
 0x2ef   :  { %v892_v7 = vmul.f32 0.125, %v890_v5 }
 0x2f0   :  { %v893_v8 = vadd.f32 1e-05, %v891_v6 }
 0x2f1   :  { %v894_v9 = vadd.f32 1e-05, %v892_v7 }
 0x2f2   :  { %1843 = vrsqrt.f32 %v893_v8 }
 0x2f3   :  { %1845 = vrsqrt.f32 %v894_v9 }
 0x2fc   :  { %v1844_v19 = vpop.eup %1843 }
 0x2fd   :  { %v1846_v10 = vpop.eup %1845 }
 0x2fe   :  { %v899_v11 = vcombine.low %v1844_v19, %v1846_v10 }
 0x300   :  { %v906_v12 = vrot.slane %v899_v11, %v2168_v60 }
 0x302   :  { %v913_v14 = vrot.slane %v906_v12, %v2168_v60 }
 0x304   :  { %v915_v16 = vmul.f32 %v913_v14, %v575_v13 }
 0x306   :  { %v920_v17 = vrot.slane %v915_v16, %v2144_v20  ;;  %v924_v18 = vrot.slane %v915_v16, %v2147_v22 }
 0x308   :  { %v927_v25 = vmul.f32 %v920_v17, %v875_v50  ;;  %v928_v36 = vmul.f32 %v924_v18, %v876_v51 }
 0x30a   :  { %v940_v27 = vadd.f32 %v933_v21, %v927_v25  ;;  %v941_v38 = vadd.f32 %v937_v24, %v928_v36 }
 0x30b   :  { %1993 = dma.done.wait [#allocation6 + $0x1], 2048 }
 0x30c   :  { %1994 = vsyncadd [#allocation6 + $0x1], 4294965248  ;;  %1065 = vmatprep.mubr.f32.mxu1 %v941_v38  ;;  %v954_v53 = vld [vmem:[#allocation3 + $0x40] sm:$0xff]  ;;  %v955_v60 = vld [vmem:[#allocation3 + $0x48] sm:$0xff] }
 0x30d   :  { %v946_v55 = vld [vmem:[#allocation3] sm:$0xff]  ;;  %1693 = vmatprep.subr.bf16.mxu1 %v954_v53  ;;  %v947_v26 = vld [vmem:[#allocation3 + $0x8] sm:$0xff]  ;;  %v956_v28 = vld [vmem:[#allocation3 + $0x50] sm:$0xff] }
 0x30e   :  { %1695 = vmatpush3.bf16.msra.mxu1 %v946_v55  ;;  %v948_v29 = vld [vmem:[#allocation3 + $0x10] sm:$0xff]  ;;  %v957_v30 = vld [vmem:[#allocation3 + $0x58] sm:$0xff]  ;;  %v958_v31 = vld [vmem:[#allocation3 + $0x60] sm:$0xff] }
 0x30f   :  { %1697 = vmatprep.subr.bf16.mxu1 %v955_v60  ;;  %v949_v22 = vld [vmem:[#allocation3 + $0x18] sm:$0xff]  ;;  %v950_v32 = vld [vmem:[#allocation3 + $0x20] sm:$0xff]  ;;  %v959_v33 = vld [vmem:[#allocation3 + $0x68] sm:$0xff] }
 0x310   :  { %v951_v34 = vld [vmem:[#allocation3 + $0x28] sm:$0xff]  ;;  %v960_v35 = vld [vmem:[#allocation3 + $0x70] sm:$0xff]  ;;  %v961_v39 = vld [vmem:[#allocation3 + $0x78] sm:$0xff] }
 0x311   :  { %v952_v37 = vld [vmem:[#allocation3 + $0x30] sm:$0xff]  ;;  %v953_v40 = vld [vmem:[#allocation3 + $0x38] sm:$0xff]  ;;  %v1384_v42 = vld [vmem:[#allocation11 + $0x18] ss:$0 sm:$0xff] }
 0x312   :  { %1699 = vmatpush3.bf16.msra.mxu1 %v947_v26  ;;  %v963_v3 = vld [vmem:[#allocation11 + $0x19] sm:$0x1]  ;;  %v1385_v7 = vld [vmem:[#allocation11 + $0x1a] ss:$0 sm:$0xff] }
 0x313   :  { %1701 = vmatprep.subr.bf16.mxu1 %v956_v28 }
 0x316   :  { %1703 = vmatpush3.bf16.msra.mxu1 %v948_v29 }
 0x317   :  { %1705 = vmatprep.subr.bf16.mxu1 %v957_v30 }
 0x31a   :  { %1707 = vmatpush3.bf16.msra.mxu1 %v949_v22 }
 0x31b   :  { %1709 = vmatprep.subr.bf16.mxu1 %v958_v31 }
 0x31e   :  { %1711 = vmatpush3.bf16.msra.mxu1 %v950_v32 }
 0x31f   :  { %1713 = vmatprep.subr.bf16.mxu1 %v959_v33 }
 0x322   :  { %1715 = vmatpush3.bf16.msra.mxu1 %v951_v34 }
 0x323   :  { %1717 = vmatprep.subr.bf16.mxu1 %v960_v35 }
 0x326   :  { %1719 = vmatpush3.bf16.msra.mxu1 %v952_v37 }
 0x327   :  { %1721 = vmatprep.subr.bf16.mxu1 %v961_v39 }
 0x32a   :  { %1723 = vmatpush3.bf16.msra.mxu1 %v953_v40 }
 0x32d   :  { %1066 = vmatmul.mubr.f32.vlgmr.msra.gmra.mrb[4].mxu1 %v940_v27 }
 0x400   :  { %v1425_v41 = vpop.f32.mrb[4].mxu1 }
 0x401   :  { %v1426_v43 = vpop.f32.mrb[5].mxu1 }
 0x402   :  { %v1427_v44 = vadd.f32 %v1426_v43, %v1425_v41 }
 0x404   :  { %v1068_v23 = vadd.f32 %v1427_v44, %v1384_v42 }
 0x406   :  { %v1071_v45 = vmax.f32 %v1068_v23, 0.0 }
 0x408   :  { %v1072_v46 = vrot.slane %v1071_v45, 4 }
 0x40a   :  { %v1073_v47 = vadd.f32 %v1072_v46, %v1071_v45 }
 0x40c   :  { %v1074_v48 = vrot.slane %v1073_v47, 2 }
 0x40e   :  { %v1075_v49 = vadd.f32 %v1074_v48, %v1073_v47 }
 0x410   :  { %v1076_v50 = vrot.slane %v1075_v49, 1 }
 0x412   :  { %v1077_v51 = vadd.f32 %v1076_v50, %v1075_v49 }
 0x414   :  { %v1078_v52 = vmul.f32 0.125, %v1077_v51 }
 0x416   :  { %v1079_v54 = vsub.f32 %v1071_v45, %v1078_v52 }
 0x418   :  { %v1080_v56 = vmul.f32 %v1079_v54, %v1079_v54 }
 0x41a   :  { %v1081_v57 = vrot.slane %v1080_v56, 4 }
 0x41c   :  { %v1082_v58 = vadd.f32 %v1081_v57, %v1080_v56 }
 0x41e   :  { %v1083_v59 = vrot.slane %v1082_v58, 2 }
 0x420   :  { %v1084_v61 = vadd.f32 %v1083_v59, %v1082_v58 }
 0x422   :  { %v1085_v62 = vrot.slane %v1084_v61, 1 }
 0x424   :  { %v1086_v63 = vadd.f32 %v1085_v62, %v1084_v61 }
 0x426   :  { %v1087_v1 = vmul.f32 0.125, %v1086_v63 }
 0x428   :  { %v1088_v2 = vadd.f32 1e-05, %v1087_v1 }
 0x42a   :  { %1847 = vrsqrt.f32 %v1088_v2 }
 0x434   :  { %v1848_v4 = vpop.eup %1847 }
 0x435   :  { %v1090_v5 = vmul.f32 %v1848_v4, %v963_v3 }
 0x437   :  { %v1094_v6 = vrot.slane %v1090_v5, %v2144_v20 }
 0x439   :  { %v1095_v8 = vmul.f32 %v1094_v6, %v1079_v54 }
 0x43b   :  { %v1100_v9 = vadd.f32 %v1385_v7, %v1095_v8 }
 0x43c   :  { %1995 = dma.done.wait [#allocation6 + $0x2], 1024 }
 0x43d   :  { %1996 = vsyncadd [#allocation6 + $0x2], 4294966272  ;;  %v2016_v19 = vmov 0.0|0.0   ;;  %vm2017_vm1 = vmmov 0   ;;  %v1105_v10 = vld [vmem:[#allocation4] sm:$0xff]  ;;  %v1106_v11 = vld [vmem:[#allocation4 + $0x8] sm:$0xff] }
 0x43e   :  { %1724 = vmatprep.subr.bf16.mxu1 %v2016_v19  ;;  %1494 = vmatprep.mubr.msk.f32.mxu1 %vm2017_vm1, %v2004_v0  ;;  %v1107_v12 = vld [vmem:[#allocation4 + $0x10] sm:$0xff]  ;;  %v1108_v13 = vld [vmem:[#allocation4 + $0x18] sm:$0xff]  ;;  %v1109_v14 = vld [vmem:[#allocation4 + $0x20] sm:$0xff] }
 0x43f   :  { %1726 = vmatpush3.bf16.msra.mxu1 %v1105_v10  ;;  %v1110_v15 = vld [vmem:[#allocation4 + $0x28] sm:$0xff]  ;;  %v1111_v16 = vld [vmem:[#allocation4 + $0x30] sm:$0xff]  ;;  %v1112_v17 = vld [vmem:[#allocation4 + $0x38] sm:$0xff] }
 0x440   :  { %1727 = vmatprep.subr.bf16.mxu1 %v2016_v19  ;;  %v1386_v18 = vld [vmem:[#allocation11 + $0x1c] ss:$0 sm:$0xff]  ;;  %v1114_v40 = vld [vmem:[#allocation11 + $0x1d] sm:$0x1]  ;;  %v1387_v44 = vld [vmem:[#allocation11 + $0x1e] ss:$0 sm:$0xff] }
 0x443   :  { %1729 = vmatpush3.bf16.msra.mxu1 %v1106_v11 }
 0x444   :  { %1730 = vmatprep.subr.bf16.mxu1 %v2016_v19 }
 0x447   :  { %1732 = vmatpush3.bf16.msra.mxu1 %v1107_v12 }
 0x448   :  { %1733 = vmatprep.subr.bf16.mxu1 %v2016_v19 }
 0x44b   :  { %1735 = vmatpush3.bf16.msra.mxu1 %v1108_v13 }
 0x44c   :  { %1736 = vmatprep.subr.bf16.mxu1 %v2016_v19 }
 0x44f   :  { %1738 = vmatpush3.bf16.msra.mxu1 %v1109_v14 }
 0x450   :  { %1739 = vmatprep.subr.bf16.mxu1 %v2016_v19 }
 0x453   :  { %1741 = vmatpush3.bf16.msra.mxu1 %v1110_v15 }
 0x454   :  { %1742 = vmatprep.subr.bf16.mxu1 %v2016_v19 }
 0x457   :  { %1744 = vmatpush3.bf16.msra.mxu1 %v1111_v16 }
 0x458   :  { %1745 = vmatprep.subr.bf16.mxu1 %v2016_v19 }
 0x45b   :  { %1747 = vmatpush3.bf16.msra.mxu1 %v1112_v17 }
 0x45e   :  { %1495 = vmatmul.mubr.f32.vlgmr.msra.gmra.mrb[6].mxu1 %v1100_v9 }
 0x531   :  { %v1202_v21 = vpop.f32.mrb[6].mxu1 }
 0x532   :  { %v1203_v24 = vadd.f32 %v1386_v18, %v1202_v21  ;;  %v1496_v25 = vpop.f32.mrb[7].mxu1 }
 0x534   :  { %v1206_v36 = vmax.f32 %v1203_v24, 0.0 }
 0x536   :  { %v1207_v27 = vrot.slane %v1206_v36, 4 }
 0x538   :  { %v1208_v38 = vadd.f32 %v1207_v27, %v1206_v36 }
 0x53a   :  { %v1209_v53 = vrot.slane %v1208_v38, 2 }
 0x53c   :  { %v1210_v55 = vadd.f32 %v1209_v53, %v1208_v38 }
 0x53e   :  { %v1211_v60 = vrot.slane %v1210_v55, 1 }
 0x540   :  { %v1212_v26 = vadd.f32 %v1211_v60, %v1210_v55 }
 0x542   :  { %v1213_v28 = vmul.f32 0.125, %v1212_v26 }
 0x544   :  { %v1214_v29 = vsub.f32 %v1206_v36, %v1213_v28 }
 0x546   :  { %v1215_v30 = vmul.f32 %v1214_v29, %v1214_v29 }
 0x548   :  { %v1216_v22 = vrot.slane %v1215_v30, 4 }
 0x54a   :  { %v1217_v31 = vadd.f32 %v1216_v22, %v1215_v30 }
 0x54c   :  { %v1218_v32 = vrot.slane %v1217_v31, 2 }
 0x54e   :  { %v1219_v33 = vadd.f32 %v1218_v32, %v1217_v31 }
 0x550   :  { %v1220_v34 = vrot.slane %v1219_v33, 1 }
 0x552   :  { %v1221_v35 = vadd.f32 %v1220_v34, %v1219_v33 }
 0x554   :  { %v1222_v37 = vmul.f32 0.125, %v1221_v35 }
 0x556   :  { %v1223_v39 = vadd.f32 1e-05, %v1222_v37 }
 0x558   :  { %1849 = vrsqrt.f32 %v1223_v39 }
 0x562   :  { %v1850_v41 = vpop.eup %1849 }
 0x563   :  { %v1225_v42 = vmul.f32 %v1850_v41, %v1114_v40 }
 0x565   :  { %v1229_v43 = vrot.slane %v1225_v42, %v2144_v20 }
 0x567   :  { %v1230_v23 = vmul.f32 %v1229_v43, %v1214_v29 }
 0x569   :  { %v1235_v45 = vadd.f32 %v1387_v44, %v1230_v23 }
 0x56a   :  { %1997 = dma.done.wait [#allocation6 + $0x3], 1024 }
 0x56b   :  { %1998 = vsyncadd [#allocation6 + $0x3], 4294966272  ;;  %1748 = vmatprep.subr.bf16.mxu1 %v2016_v19  ;;  %1529 = vmatprep.mubr.msk.f32.mxu1 %vm2017_vm1, %v2004_v0  ;;  %v1239_v46 = vld [vmem:[#allocation5] sm:$0xff]  ;;  %v1240_v47 = vld [vmem:[#allocation5 + $0x8] sm:$0xff] }
 0x56c   :  { %1750 = vmatpush3.bf16.msra.mxu1 %v1239_v46  ;;  %v1241_v48 = vld [vmem:[#allocation5 + $0x10] sm:$0xff]  ;;  %v1242_v20 = vld [vmem:[#allocation5 + $0x18] sm:$0xff]  ;;  %v1243_v49 = vld [vmem:[#allocation5 + $0x20] sm:$0xff] }
 0x56d   :  { %1751 = vmatprep.subr.bf16.mxu1 %v2016_v19  ;;  %v1244_v0 = vld [vmem:[#allocation5 + $0x28] sm:$0xff]  ;;  %v1245_v50 = vld [vmem:[#allocation5 + $0x30] sm:$0xff]  ;;  %v1246_v51 = vld [vmem:[#allocation5 + $0x38] sm:$0xff] }
 0x56e   :  { %v1388_v52 = vld [vmem:[#allocation11 + $0x20] ss:$0 sm:$0xff] }
 0x570   :  { %1753 = vmatpush3.bf16.msra.mxu1 %v1240_v47 }
 0x571   :  { %1754 = vmatprep.subr.bf16.mxu1 %v2016_v19 }
 0x574   :  { %1756 = vmatpush3.bf16.msra.mxu1 %v1241_v48 }
 0x575   :  { %1757 = vmatprep.subr.bf16.mxu1 %v2016_v19 }
 0x578   :  { %1759 = vmatpush3.bf16.msra.mxu1 %v1242_v20 }
 0x579   :  { %1760 = vmatprep.subr.bf16.mxu1 %v2016_v19 }
 0x57c   :  { %1762 = vmatpush3.bf16.msra.mxu1 %v1243_v49 }
 0x57d   :  { %1763 = vmatprep.subr.bf16.mxu1 %v2016_v19 }
 0x580   :  { %1765 = vmatpush3.bf16.msra.mxu1 %v1244_v0 }
 0x581   :  { %1766 = vmatprep.subr.bf16.mxu1 %v2016_v19 }
 0x584   :  { %1768 = vmatpush3.bf16.msra.mxu1 %v1245_v50 }
 0x585   :  { %1769 = vmatprep.subr.bf16.mxu1 %v2016_v19 }
 0x588   :  { %1771 = vmatpush3.bf16.msra.mxu1 %v1246_v51 }
 0x58b   :  { %1530 = vmatmul.mubr.f32.vlgmr.msra.gmra.mrb[8].mxu1 %v1235_v45 }
 0x65e   :  { %v1333_v54 = vpop.f32.mrb[8].mxu1 }
 0x65f   :  { %v1334_v56 = vadd.f32 %v1388_v52, %v1333_v54  ;;  %v1531_v57 = vpop.f32.mrb[9].mxu1 }
 0x661   :  { %1337 = vmax.xlane.f32.xlu0 %v1334_v56 }
 0x6ee   :  { %v1338_v58 = vpop.xlane.xlu0 %1337 }
 0x6ef   :  { %v1339_v59 = vsub.f32 %v1334_v56, %v1338_v58 }
 0x6f1   :  { %v1340_v61 = vmul.f32 1.442695, %v1339_v59 }
 0x6f3   :  { %1851 = vpow2.f32 %v1340_v61 }
 0x6fd   :  { %v1852_v62 = vpop.eup %1851 }
 0x6fe   :  { %1342 = vadd.xlane.f32.xlu0 %v1852_v62 }
 0x78b   :  { %v1343_v63 = vpop.xlane.xlu0 %1342 }
 0x78c   :  { %1853 = vrcp.f32 %v1343_v63 }
 0x796   :  { %v1854_v1 = vpop.eup %1853 }
 0x797   :  { %v1345_v2 = vmul.f32 %v1854_v1, %v1852_v62 }
 0x799   :  { %1346 = vst [vmem:[%s2232_s7] sm:$0xff] %v1345_v2 }
 0x79a   :  { %1351 = vsyncpa [#allocation8], 1 }
 0x79b   :  { %1352 = vsyncpa [#allocation10], 1 }
 0x79c   :  { %1353 = vsyncmov [#allocation6] }
 0x79f   :  { %s1354_s9 = vpop.sfrf %1353 }
 0x7a0   :  { %p1389_p6 = scmp.ne.s32.totalorder %s1354_s9, 0 }
 0x7a2   :  { %1358 = shalt.err (%p1389_p6)  }
 0x7a3   :  { %1360 = vsyncmov [#allocation6 + $0x1] }
 0x7a6   :  { %s1361_s10 = vpop.sfrf %1360 }
 0x7a7   :  { %p1390_p7 = scmp.ne.s32.totalorder %s1361_s10, 0 }
 0x7a9   :  { %1365 = shalt.err (%p1390_p7)  }
 0x7aa   :  { %1367 = vsyncmov [#allocation6 + $0x2] }
 0x7ad   :  { %s1368_s12 = vpop.sfrf %1367 }
 0x7ae   :  { %p1391_p8 = scmp.ne.s32.totalorder %s1368_s12, 0 }
 0x7b0   :  { %1372 = shalt.err (%p1391_p8)  }
 0x7b1   :  { %1374 = vsyncmov [#allocation6 + $0x3] }
 0x7b4   :  { %s1375_s13 = vpop.sfrf %1374 }
 0x7b5   :  { %p1392_p9 = scmp.ne.s32.totalorder %s1375_s13, 0 }
 0x7b7   :  { %1379 = shalt.err (%p1392_p9)  }

</bundles_post_ra>
